<compile_context>
chip_gen: v5e
topology: v5e:2x2
jax: 0.10.0
libtpu: 0.0.40
codegen_flags: <defaults>
</compile_context>

<pallas_src>
import functools

import jax
import jax.numpy as jnp
from jax.experimental import pallas as pl
from jax.experimental.pallas import tpu as pltpu


def _round_up(v, m):
    return ((v + m - 1) // m) * m


def _attention_kernel(x_ref, wqkv_ref, wproj_ref, bias_ref, mask_ref, o_ref,
                      *, num_heads, head_dim, compute_dtype):
    H, hd = num_heads, head_dim
    G = 3 * hd                      # per-head [q | k | v] column group width

    x = x_ref[...]                  # (BNp, Cp) bf16, batch folded into rows

    # 1) Fused QKV projection: one 2-D matmul with the compact weight.
    #    Softmax scale is already folded into the q columns.
    qkv = jnp.dot(x, wqkv_ref[...],
                  preferred_element_type=jnp.float32)        # (BNp, Kp) f32

    # 2) Head split after the matmul: columns are ordered head-major
    #    [q_h | k_h | v_h]; a few lane slices + one stack on a tiny tensor.
    qkv_h = jnp.stack([qkv[:, h * G:(h + 1) * G] for h in range(H)],
                      axis=0)                                 # (H, BNp, 3*hd)
    q = qkv_h[:, :, 0 * hd:1 * hd].astype(compute_dtype)      # (H, BNp, hd)
    k = qkv_h[:, :, 1 * hd:2 * hd].astype(compute_dtype)
    v = qkv_h[:, :, 2 * hd:3 * hd].astype(compute_dtype)

    # 3) Attention over the folded (B*N) row space, batched over heads.
    #    The additive mask removes cross-batch (and padding-row) interactions.
    s = jnp.einsum("hnd,hmd->hnm", q, k,
                   preferred_element_type=jnp.float32)        # (H, BNp, BNp)
    s = s + mask_ref[...]                                     # (BNp,BNp) bcast over H
    s = s - jnp.max(s, axis=-1, keepdims=True)
    e = jnp.exp(s)
    p = e * pl.reciprocal(jnp.sum(e, axis=-1, keepdims=True), approx=True)

    ctx = jnp.einsum("hnm,hmd->hnd", p.astype(compute_dtype), v,
                     preferred_element_type=jnp.float32)      # (H, BNp, hd)

    # 4) Head-concat + output projection: batched matmul over heads on the MXU,
    #    then an H-way VPU sum (Mosaic dot_general can't contract h and d
    #    jointly) and the bias add.
    yh = jnp.einsum("hnd,hdc->hnc", ctx.astype(compute_dtype), wproj_ref[...],
                    preferred_element_type=jnp.float32)        # (H, BNp, Cp)
    y = jnp.sum(yh, axis=0) + bias_ref[...]                    # (BNp, Cp)

    # Lane-dense (BNp, 128) store: full unmasked vst.
    o_ref[...] = y.astype(o_ref.dtype)


def attention_forward(x, w_qkv, w_proj, b_proj, *, num_heads,
                      compute_dtype=jnp.bfloat16):
    """Pallas forward for LGSleepNet Attention.

    x:      (B, N, C)  input (PyTorch layout)
    w_qkv:  (3C, C)    nn.Linear(dim, 3*dim, bias=False).weight  (out, in)
    w_proj: (C, C)     nn.Linear(dim, dim).weight                (out, in)
    b_proj: (C,)       nn.Linear(dim, dim).bias
    """
    B, N, C = x.shape
    H = num_heads
    hd = C // H
    scale = hd ** (-0.5)
    LANE, SUB = 128, 8

    Cp = _round_up(C, LANE)          # 40  -> 128 (lane-dense channels)
    Kp = _round_up(3 * C, LANE)      # 120 -> 128 (fused qkv output width)
    BN = B * N
    BNp = _round_up(BN, SUB)         # 16  -> 16  (batch folded into rows)

    out_dtype = x.dtype

    # ---- compact, lane-dense weight layouts (built once in the wrapper) ----
    # Fused QKV weight (Cp, Kp); column j = h*(3*hd) + t*hd + dd for t in {q,k,v}.
    # Softmax scale pre-folded into the q columns.
    w3 = w_qkv.reshape(3, H, hd, C)                                    # (t, h, dd, c)
    w3 = w3 * jnp.array([scale, 1.0, 1.0], w3.dtype).reshape(3, 1, 1, 1)
    wk = jnp.transpose(w3, (3, 1, 0, 2)).reshape(C, 3 * C)             # (C, 3C) h-major
    wk = jnp.pad(wk, ((0, Cp - C), (0, Kp - 3 * C)))                   # (Cp, Kp)

    # Per-head output projection (H, hd, Cp): fuses head-concat into a batched
    # matmul + H-way sum inside the kernel (no relayout of the context tensor).
    wp = w_proj.T.reshape(H, hd, C)
    wp = jnp.pad(wp, ((0, 0), (0, 0), (0, Cp - C)))                    # (H, hd, Cp)

    b_k = jnp.pad(b_proj, (0, Cp - C)).reshape(1, Cp).astype(jnp.float32)

    # Fold batch into rows and pad; zero padding of channels / rows is inert
    # (padded-row batch ids are >= B, so the mask keeps them out of real rows).
    x2 = jnp.pad(x.reshape(BN, C), ((0, BNp - BN), (0, Cp - C)))
    row_id = jnp.arange(BNp) // N
    mask = jnp.where(row_id[:, None] == row_id[None, :],
                     0.0, -1e9).astype(jnp.float32)                    # (BNp, BNp)

    # bf16 operands for the MXU (f32 accumulation inside the kernel).
    x2 = x2.astype(compute_dtype)
    wk = wk.astype(compute_dtype)
    wp = wp.astype(compute_dtype)

    kernel = functools.partial(_attention_kernel, num_heads=H, head_dim=hd,
                               compute_dtype=compute_dtype)

    out = pl.pallas_call(
        kernel,
        out_shape=jax.ShapeDtypeStruct((BNp, Cp), out_dtype),
        grid_spec=pltpu.PrefetchScalarGridSpec(
            num_scalar_prefetch=0,
            # Single grid step: per-step overhead dominates at these shapes, so
            # the whole batch-folded problem runs in one invocation (also keeps
            # the tiny problem on one TensorCore on v7x).
            grid=(1,),
            in_specs=[
                pl.BlockSpec((BNp, Cp), lambda i: (0, 0)),        # x (rows folded)
                pl.BlockSpec((Cp, Kp), lambda i: (0, 0)),         # fused qkv weight
                pl.BlockSpec((H, hd, Cp), lambda i: (0, 0, 0)),   # per-head proj weight
                pl.BlockSpec((1, Cp), lambda i: (0, 0)),          # proj bias
                pl.BlockSpec((BNp, BNp), lambda i: (0, 0)),       # batch mask
            ],
            out_specs=pl.BlockSpec((BNp, Cp), lambda i: (0, 0)),
        ),
        compiler_params=pltpu.CompilerParams(
            dimension_semantics=("arbitrary",),
        ),
    )(x2, wk, wp, b_k, mask)

    # Drop row/lane padding outside the kernel (cheap XLA slice + reshape).
    return out[:BN, :C].reshape(B, N, C)


def attention_reference(x, w_qkv, w_proj, b_proj, *, num_heads):
    """Pure-JAX f32 reference mirroring the PyTorch forward exactly."""
    B, N, C = x.shape
    hd = C // num_heads
    scale = hd ** (-0.5)

    qkv = x @ w_qkv.T                                       # (B, N, 3C)
    qkv = qkv.reshape(B, N, 3, num_heads, hd)
    qkv = jnp.transpose(qkv, (2, 0, 3, 1, 4))               # (3, B, H, N, hd)
    q, k, v = qkv[0], qkv[1], qkv[2]

    attn = jnp.einsum("bhnd,bhmd->bhnm", q, k) * scale
    attn = jax.nn.softmax(attn, axis=-1)
    out = jnp.einsum("bhnm,bhmd->bhnd", attn, v)            # (B, H, N, hd)
    out = jnp.transpose(out, (0, 2, 1, 3)).reshape(B, N, C)
    return out @ w_proj.T + b_proj


if __name__ == "__main__":
    # Small shapes consistent with the module: num_heads=5, so C divisible by 5.
    B, N, C = 2, 8, 40
    num_heads = 5

    key = jax.random.PRNGKey(0)
    k_x, k_wqkv, k_wproj, k_bproj = jax.random.split(key, 4)

    x = jax.random.normal(k_x, (B, N, C), dtype=jnp.float32)

    # Deterministic synthetic parameters in PyTorch (out, in) layout.
    w_qkv = jax.random.normal(k_wqkv, (3 * C, C), dtype=jnp.float32) * 0.05
    w_proj = jax.random.normal(k_wproj, (C, C), dtype=jnp.float32) * 0.05
    b_proj = jax.random.normal(k_bproj, (C,), dtype=jnp.float32) * 0.05

    out = attention_forward(x, w_qkv, w_proj, b_proj, num_heads=num_heads)
    out = jax.block_until_ready(out)

    ref = attention_reference(x, w_qkv, w_proj, b_proj, num_heads=num_heads)
    assert out.shape == (B, N, C)
    # bf16 MXU operands + approx reciprocal -> compare with a relaxed tolerance.
    assert jnp.allclose(out, ref, atol=2e-2, rtol=2e-2), "mismatch vs reference"

    print("KERNEL_OK")
</pallas_src>

<mosaic_0001>
module attributes {stable_mosaic.version = 11 : i64} {
  func.func @_attention_kernel(%arg0: i32, %arg1: memref<16x128xbf16, #tpu.memory_space<vmem>>, %arg2: memref<128x128xbf16, #tpu.memory_space<vmem>>, %arg3: memref<5x8x128xbf16, #tpu.memory_space<vmem>>, %arg4: memref<1x128xf32, #tpu.memory_space<vmem>>, %arg5: memref<16x16xf32, #tpu.memory_space<vmem>>, %arg6: memref<16x128xf32, #tpu.memory_space<vmem>>) attributes {dimension_semantics = [#tpu.dimension_semantics<arbitrary>], iteration_bounds = array<i64: 1>, scalar_prefetch = 0 : i64, scratch_operands = 0 : i64, tpu.core_type = #tpu.core_type<tc>, window_params = [{pipeline_mode = #tpu.pipeline_mode<synchronous>, transform_indices = @transform_0, window_bounds = array<i64: 16, 128>}, {pipeline_mode = #tpu.pipeline_mode<synchronous>, transform_indices = @transform_1, window_bounds = array<i64: 128, 128>}, {pipeline_mode = #tpu.pipeline_mode<synchronous>, transform_indices = @transform_2, window_bounds = array<i64: 5, 8, 128>}, {pipeline_mode = #tpu.pipeline_mode<synchronous>, transform_indices = @transform_3, window_bounds = array<i64: 1, 128>}, {pipeline_mode = #tpu.pipeline_mode<synchronous>, transform_indices = @transform_4, window_bounds = array<i64: 16, 16>}, {pipeline_mode = #tpu.pipeline_mode<synchronous>, transform_indices = @transform_5, window_bounds = array<i64: 16, 128>}]} {
    %c0 = arith.constant 0 : index
    %c0_0 = arith.constant 0 : index
    %0 = vector.load %arg1[%c0, %c0_0] : memref<16x128xbf16, #tpu.memory_space<vmem>>, vector<16x128xbf16>
    %c0_1 = arith.constant 0 : index
    %c0_2 = arith.constant 0 : index
    %1 = vector.load %arg2[%c0_1, %c0_2] : memref<128x128xbf16, #tpu.memory_space<vmem>>, vector<128x128xbf16>
    %cst = arith.constant dense<0.000000e+00> : vector<16x128xf32>
    %2 = tpu.matmul %0, %1, %cst {dimension_numbers = #tpu.dot_dimension_numbers<[1], [0], [0], [1], [0, 0, 1, 1], [], []>} : vector<16x128xbf16>, vector<128x128xbf16>, vector<16x128xf32> -> vector<16x128xf32>
    %3 = vector.extract_strided_slice %2 {offsets = [0, 0], sizes = [16, 24], strides = [1, 1]} : vector<16x128xf32> to vector<16x24xf32>
    %4 = vector.extract_strided_slice %2 {offsets = [0, 24], sizes = [16, 24], strides = [1, 1]} : vector<16x128xf32> to vector<16x24xf32>
    %5 = vector.extract_strided_slice %2 {offsets = [0, 48], sizes = [16, 24], strides = [1, 1]} : vector<16x128xf32> to vector<16x24xf32>
    %6 = vector.extract_strided_slice %2 {offsets = [0, 72], sizes = [16, 24], strides = [1, 1]} : vector<16x128xf32> to vector<16x24xf32>
    %7 = vector.extract_strided_slice %2 {offsets = [0, 96], sizes = [16, 24], strides = [1, 1]} : vector<16x128xf32> to vector<16x24xf32>
    %8 = vector.shape_cast %3 : vector<16x24xf32> to vector<1x16x24xf32>
    %9 = vector.shape_cast %4 : vector<16x24xf32> to vector<1x16x24xf32>
    %10 = vector.shape_cast %5 : vector<16x24xf32> to vector<1x16x24xf32>
    %11 = vector.shape_cast %6 : vector<16x24xf32> to vector<1x16x24xf32>
    %12 = vector.shape_cast %7 : vector<16x24xf32> to vector<1x16x24xf32>
    %13 = tpu.concatenate %8, %9, %10, %11, %12 in 0 : vector<1x16x24xf32>, vector<1x16x24xf32>, vector<1x16x24xf32>, vector<1x16x24xf32>, vector<1x16x24xf32> -> vector<5x16x24xf32>
    %14 = vector.extract_strided_slice %13 {offsets = [0, 0, 0], sizes = [5, 16, 8], strides = [1, 1, 1]} : vector<5x16x24xf32> to vector<5x16x8xf32>
    %15 = arith.truncf %14 : vector<5x16x8xf32> to vector<5x16x8xbf16>
    %16 = vector.extract_strided_slice %13 {offsets = [0, 0, 8], sizes = [5, 16, 8], strides = [1, 1, 1]} : vector<5x16x24xf32> to vector<5x16x8xf32>
    %17 = arith.truncf %16 : vector<5x16x8xf32> to vector<5x16x8xbf16>
    %18 = vector.extract_strided_slice %13 {offsets = [0, 0, 16], sizes = [5, 16, 8], strides = [1, 1, 1]} : vector<5x16x24xf32> to vector<5x16x8xf32>
    %19 = arith.truncf %18 : vector<5x16x8xf32> to vector<5x16x8xbf16>
    "tpu.trace_start"() <{level = 10 : i32, message = "hnd,hmd->hnm"}> : () -> ()
    %cst_3 = arith.constant dense<0.000000e+00> : vector<5x16x16xf32>
    %20 = tpu.matmul %15, %17, %cst_3 {dimension_numbers = #tpu.dot_dimension_numbers<[2], [2], [1], [1], [0, 0, 0, 1, 1, 1], [0], [0]>} : vector<5x16x8xbf16>, vector<5x16x8xbf16>, vector<5x16x16xf32> -> vector<5x16x16xf32>
    "tpu.trace_stop"() : () -> ()
    %c0_4 = arith.constant 0 : index
    %c0_5 = arith.constant 0 : index
    %21 = vector.load %arg5[%c0_4, %c0_5] : memref<16x16xf32, #tpu.memory_space<vmem>>, vector<16x16xf32>
    %22 = vector.shape_cast %21 : vector<16x16xf32> to vector<1x16x16xf32>
    %23 = vector.broadcast %22 : vector<1x16x16xf32> to vector<5x16x16xf32>
    %24 = arith.addf %20, %23 : vector<5x16x16xf32>
    %cst_6 = arith.constant dense<0xFF800000> : vector<5x16xf32>
    %25 = vector.multi_reduction <maximumf>, %24, %cst_6 [2] : vector<5x16x16xf32> to vector<5x16xf32>
    %26 = vector.shape_cast %25 : vector<5x16xf32> to vector<5x16x1xf32>
    %27 = vector.broadcast %26 : vector<5x16x1xf32> to vector<5x16x16xf32>
    %28 = arith.subf %24, %27 : vector<5x16x16xf32>
    %29 = math.exp %28 : vector<5x16x16xf32>
    %cst_7 = arith.constant dense<0.000000e+00> : vector<5x16xf32>
    %30 = vector.multi_reduction <add>, %29, %cst_7 [2] : vector<5x16x16xf32> to vector<5x16xf32>
    %31 = vector.shape_cast %30 : vector<5x16xf32> to vector<5x16x1xf32>
    %32 = tpu.reciprocal %31 {approx = true} : vector<5x16x1xf32> -> vector<5x16x1xf32>
    %33 = vector.broadcast %32 : vector<5x16x1xf32> to vector<5x16x16xf32>
    %34 = arith.mulf %29, %33 : vector<5x16x16xf32>
    %35 = arith.truncf %34 : vector<5x16x16xf32> to vector<5x16x16xbf16>
    "tpu.trace_start"() <{level = 10 : i32, message = "hnm,hmd->hnd"}> : () -> ()
    %cst_8 = arith.constant dense<0.000000e+00> : vector<5x16x8xf32>
    %36 = tpu.matmul %35, %19, %cst_8 {dimension_numbers = #tpu.dot_dimension_numbers<[2], [1], [1], [2], [0, 0, 0, 1, 1, 2], [0], [0]>} : vector<5x16x16xbf16>, vector<5x16x8xbf16>, vector<5x16x8xf32> -> vector<5x16x8xf32>
    "tpu.trace_stop"() : () -> ()
    %37 = arith.truncf %36 : vector<5x16x8xf32> to vector<5x16x8xbf16>
    %c0_9 = arith.constant 0 : index
    %c0_10 = arith.constant 0 : index
    %c0_11 = arith.constant 0 : index
    %38 = vector.load %arg3[%c0_9, %c0_10, %c0_11] : memref<5x8x128xbf16, #tpu.memory_space<vmem>>, vector<5x8x128xbf16>
    "tpu.trace_start"() <{level = 10 : i32, message = "hnd,hdc->hnc"}> : () -> ()
    %cst_12 = arith.constant dense<0.000000e+00> : vector<5x16x128xf32>
    %39 = tpu.matmul %37, %38, %cst_12 {dimension_numbers = #tpu.dot_dimension_numbers<[2], [1], [1], [2], [0, 0, 0, 1, 1, 2], [0], [0]>} : vector<5x16x8xbf16>, vector<5x8x128xbf16>, vector<5x16x128xf32> -> vector<5x16x128xf32>
    "tpu.trace_stop"() : () -> ()
    %cst_13 = arith.constant dense<0.000000e+00> : vector<16x128xf32>
    %40 = vector.multi_reduction <add>, %39, %cst_13 [0] : vector<5x16x128xf32> to vector<16x128xf32>
    %c0_14 = arith.constant 0 : index
    %c0_15 = arith.constant 0 : index
    %41 = vector.load %arg4[%c0_14, %c0_15] : memref<1x128xf32, #tpu.memory_space<vmem>>, vector<1x128xf32>
    %42 = vector.broadcast %41 : vector<1x128xf32> to vector<16x128xf32>
    %43 = arith.addf %40, %42 : vector<16x128xf32>
    %c0_16 = arith.constant 0 : index
    %c0_17 = arith.constant 0 : index
    %44 = vector.load %arg6[%c0_16, %c0_17] : memref<16x128xf32, #tpu.memory_space<vmem>>, vector<16x128xf32>
    tpu.vector_store %arg6[%c0_16, %c0_17], %43 {strides = array<i32>} : memref<16x128xf32, #tpu.memory_space<vmem>>, vector<16x128xf32>,
    return
  }
  func.func @transform_0(%arg0: i32) -> (i32, i32) {
    %c0_i32 = arith.constant 0 : i32
    %c0_i32_0 = arith.constant 0 : i32
    %c0_i32_1 = arith.constant 0 : i32
    return %c0_i32, %c0_i32_0 : i32, i32
  }
  func.func @transform_1(%arg0: i32) -> (i32, i32) {
    %c0_i32 = arith.constant 0 : i32
    %c0_i32_0 = arith.constant 0 : i32
    %c0_i32_1 = arith.constant 0 : i32
    return %c0_i32, %c0_i32_0 : i32, i32
  }
  func.func @transform_2(%arg0: i32) -> (i32, i32, i32) {
    %c0_i32 = arith.constant 0 : i32
    %c0_i32_0 = arith.constant 0 : i32
    %c0_i32_1 = arith.constant 0 : i32
    %c0_i32_2 = arith.constant 0 : i32
    return %c0_i32, %c0_i32_0, %c0_i32_1 : i32, i32, i32
  }
  func.func @transform_3(%arg0: i32) -> (i32, i32) {
    %c0_i32 = arith.constant 0 : i32
    %c0_i32_0 = arith.constant 0 : i32
    %c0_i32_1 = arith.constant 0 : i32
    return %c0_i32, %c0_i32_0 : i32, i32
  }
  func.func @transform_4(%arg0: i32) -> (i32, i32) {
    %c0_i32 = arith.constant 0 : i32
    %c0_i32_0 = arith.constant 0 : i32
    %c0_i32_1 = arith.constant 0 : i32
    return %c0_i32, %c0_i32_0 : i32, i32
  }
  func.func @transform_5(%arg0: i32) -> (i32, i32) {
    %c0_i32 = arith.constant 0 : i32
    %c0_i32_0 = arith.constant 0 : i32
    %c0_i32_1 = arith.constant 0 : i32
    return %c0_i32, %c0_i32_0 : i32, i32
  }
}

</mosaic_0001>

<bundles_post_ra>
// kernel: tpu_custom_call.1
= control target key start
LH: loop header
LB: loop body
LE: loop exit
PB: predicated region body
PF: predicated region fallthrough
CT: control target
= control target key end

     0   :  { %10 = vsyncpa [#allocation3], 0  ;;  %s1213_s0 = inlined_call_operand.hbm [shape: bf16[16,128], index: 0, kind: input, shape index: {}]   ;;  %s1214_s1 = inlined_call_operand.hbm [shape: bf16[128,128], index: 1, kind: input, shape index: {}]   ;;  %s1215_s2 = inlined_call_operand.hbm [shape: bf16[5,8,128], index: 2, kind: input, shape index: {}]   ;;  %s1216_s3 = inlined_call_operand.vmem [shape: f32[1,128], index: 3, kind: input, shape index: {}]   ;;  %s1217_s4 = inlined_call_operand.hbm [shape: f32[16,16], index: 4, kind: input, shape index: {}]   ;;  %s1218_s5 = inlined_call_operand.hbm [shape: f32[16,128], index: 5, kind: output, shape index: {}]  }
   0x1   :  { %11 = vsyncpa [#allocation6], 0 }
   0x2   :  { %12 = vsyncpa [#allocation9], 0 }
   0x3   :  { %13 = vsyncpa [#allocation4], 0  ;;  %s31_s20 = sshll.u32 %s1214_s1, 4  ;;  %s1033_s21 = smov [#allocation5]   ;;  %s32_s20 = int_to_ptr.hbm [resolvable:$true] %s31_s20 }
   0x4   :  { %s33_s22 = sshll.u32 %s1033_s21, 4  ;;  %s18_s25 = sshll.u32 %s1213_s0, 4  ;;  %s34_s22 = int_to_ptr.vmem [resolvable:$true] %s33_s22  ;;  %s19_s25 = int_to_ptr.hbm [resolvable:$true] %s18_s25 }
   0x5   :  { %s1034_s26 = smov 64   ;;  %s1035_s27 = smov 4  }
   0x6   :  { %39 = dma.hbm_to_vmem [thread:$0]  %s32_s20, 1024, %s34_s22, [#allocation6], %s1034_s26, %s1034_s26, %s1035_s27  }
   0x7   :  { %s1036_s28 = smov [#allocation2]   ;;  %s44_s7 = sshll.u32 %s1215_s2, 4  ;;  %s45_s7 = int_to_ptr.hbm [resolvable:$true] %s44_s7 }
   0x8   :  { %s20_s29 = sshll.u32 %s1036_s28, 4  ;;  %s59_s9 = sshll.u32 %s1217_s4, 4  ;;  %s21_s29 = int_to_ptr.vmem [resolvable:$true] %s20_s29  ;;  %s60_s9 = int_to_ptr.hbm [resolvable:$true] %s59_s9 }
   0x9   :  { %26 = dma.hbm_to_vmem [thread:$0]  %s19_s25, 128, %s21_s29, [#allocation3], %s1034_s26, %s1034_s26, %s1035_s27  }
   0xa   :  { %s1037_s10 = smov [#allocation7]   ;;  %s1038_s0 = smov [#allocation8]  }
   0xb   :  { %s46_s11 = sshll.u32 %s1037_s10, 4  ;;  %s61_s12 = sshll.u32 %s1038_s0, 4  ;;  %s47_s11 = int_to_ptr.vmem [resolvable:$true] %s46_s11  ;;  %s62_s12 = int_to_ptr.vmem [resolvable:$true] %s61_s12 }
   0xc   :  { %52 = dma.hbm_to_vmem [thread:$0]  %s45_s7, 320, %s47_s11, [#allocation6], %s1034_s26, %s1034_s26, %s1035_s27  }
   0xd   :  { %s1039_s13 = smov 128   ;;  %s1040_s14 = smov 8  }
   0xe   :  { %67 = dma.hbm_to_vmem [thread:$0]  %s60_s9, 256, %s62_s12, [#allocation9], %s1039_s13, %s1039_s13, %s1040_s14  }
   0xf   :  { %1025 = dma.done.wait [#allocation3], 128  }
  0x10   :  { %1026 = vsyncadd [#allocation3], 4294967168 }
  0x11   :  { %1027 = dma.done.wait [#allocation6], 1344  }
  0x12   :  { %1028 = vsyncadd [#allocation6], 4294965952 }
  0x13   :  { %1029 = dma.done.wait [#allocation9], 256  }
  0x14   :  { %1030 = vsyncadd [#allocation9], 4294967040  ;;  %v828_v0 = vld [vmem:[#allocation5 + $0x38] sm:$0xff]  ;;  %v827_v1 = vld [vmem:[#allocation5 + $0x30] sm:$0xff]  ;;  %s1041_s2 = smov 56   ;;  %s1042_s4 = smov 104  }
  0x15   :  { %157 = vmatpush.bf16.msra.mxu0 %v828_v0  ;;  %v826_v2 = vld [vmem:[#allocation5 + $0x28] sm:$0xff]  ;;  %v825_v3 = vld [vmem:[#allocation5 + $0x20] sm:$0xff]  ;;  %v824_v4 = vld [vmem:[#allocation5 + $0x18] sm:$0xff]  ;;  %s1043_s15 = smov 120   ;;  %s1044_s16 = smov 32   ;;  %vm216_vm0 = vcmask 64512  }
  0x16   :  { %v823_v5 = vld [vmem:[#allocation5 + $0x10] sm:$0xff]  ;;  %v822_v6 = vld [vmem:[#allocation5 + $0x8] sm:$0xff]  ;;  %v821_v7 = vld [vmem:[#allocation5] sm:$0xff]  ;;  %s1045_s17 = smov 80   ;;  %vm345_vm1 = vcmask 130048   ;;  %s1046_s18 = smov 112  }
  0x17   :  { %v820_v8 = vld [vmem:[#allocation2] sm:$0xff]  ;;  %vm614_vm2 = vcmask 1043456   ;;  %s1047_s21 = smov [#allocation10]   ;;  %s754_s25 = sshll.u32 %s1218_s5, 4  ;;  %s755_s25 = int_to_ptr.hbm [resolvable:$true] %s754_s25 }
  0x18   :  { %v207_v55 = vld [vmem:[#allocation8] sm:$0xff]  ;;  %v208_v59 = vld [vmem:[#allocation8 + $0x8] sm:$0xff]  ;;  %s752_s22 = sshll.u32 %s1047_s21, 4  ;;  %s753_s22 = int_to_ptr.vmem [resolvable:$true] %s752_s22 }
  0x19   :  { %158 = vmatpush.bf16.msra.mxu0 %v827_v1 }
  0x1d   :  { %159 = vmatpush.bf16.msra.mxu0 %v826_v2 }
  0x21   :  { %160 = vmatpush.bf16.msra.mxu0 %v825_v3 }
  0x25   :  { %161 = vmatpush.bf16.msra.mxu0 %v824_v4 }
  0x29   :  { %162 = vmatpush.bf16.msra.mxu0 %v823_v5 }
  0x2d   :  { %163 = vmatpush.bf16.msra.mxu0 %v822_v6 }
  0x31   :  { %164 = vmatpush.bf16.msra.mxu0 %v821_v7 }
  0x34   :  { %165 = vmatmul.bf16.vlgmr.msra.gmra.mxu0 %v820_v8 }
  0xb1   :  { %v166_v9 = vpop.f32.mrf.mxu0 }
  0xb2   :  { %v197_v10 = vpack.c.bf16 %v166_v9, %v166_v9 }
  0xb4   :  { %v211_v14 = vunpack.c.l.b16 %v197_v10 }
  0xb9   :  { %v168_v11 = vpop.f32.mrf.mxu0 }
  0xba   :  { %v854_v12 = vpack.i.bf16 %v168_v11, %v166_v9  ;;  %v198_v13 = vpack.c.bf16 %v168_v11, %v168_v11 }
  0xbc   :  { %855 = vrot.lane.b32.xlu1 %v854_v12, %s1041_s2  ;;  %845 = vrot.lane.b32.xlu0 %v854_v12, %s1042_s4  ;;  %v212_v15 = vunpack.c.l.b16 %v198_v13 }
  0xbe   :  { %v1093_v16 = vpack.c.b16 %v212_v15, %v211_v14 }
  0xc0   :  { %214 = vrot.lane.b32.xlu2 %v1093_v16, %s1043_s15 }
  0xc4   :  { %860 = vrot.lane.b32.xlu1 %v854_v12, %s1044_s16  ;;  %850 = vrot.lane.b32.xlu0 %v854_v12, %s1045_s17 }
 0x11a   :  { %v215_v17 = vpop.permute.xlu2 %214 }
 0x11b   :  { %v221_v18 = vsel %vm216_vm0, %v215_v17, 0 }
 0x11c   :  { %230 = vmatpush.bf16.xpose.msra.mxu1 %v221_v18 }
 0x123   :  { %805 = vmatmul.msk.bf16.vlgmr.msra.gmra.mxu1 %vm216_vm0, %v1093_v16 }
 0x12e   :  { %v856_v19 = vpop.permute.xlu1 %855  ;;  %v846_v20 = vpop.permute.xlu0 %845 }
 0x12f   :  { %v858_v21 = vunpack.i.h.bf16 %v856_v19  ;;  %v857_v22 = vunpack.i.l.bf16 %v856_v19  ;;  %v848_v23 = vunpack.i.h.bf16 %v846_v20  ;;  %v847_v24 = vunpack.i.l.bf16 %v846_v20 }
 0x131   :  { %v204_v25 = vpack.c.bf16 %v858_v21, %v858_v21  ;;  %v203_v26 = vpack.c.bf16 %v857_v22, %v857_v22  ;;  %v200_v27 = vpack.c.bf16 %v848_v23, %v848_v23  ;;  %v199_v28 = vpack.c.bf16 %v847_v24, %v847_v24 }
 0x133   :  { %v294_v29 = vunpack.c.l.b16 %v204_v25  ;;  %v293_v30 = vunpack.c.l.b16 %v203_v26  ;;  %v240_v31 = vunpack.c.l.b16 %v200_v27  ;;  %v239_v32 = vunpack.c.l.b16 %v199_v28 }
 0x135   :  { %v1100_v33 = vpack.c.b16 %v294_v29, %v293_v30  ;;  %v1102_v34 = vpack.c.b16 %v240_v31, %v239_v32 }
 0x136   :  { %v861_v35 = vpop.permute.xlu1 %860  ;;  %v851_v36 = vpop.permute.xlu0 %850 }
 0x137   :  { %v863_v37 = vunpack.i.h.bf16 %v861_v35  ;;  %v862_v38 = vunpack.i.l.bf16 %v861_v35  ;;  %v853_v39 = vunpack.i.h.bf16 %v851_v36  ;;  %v852_v40 = vunpack.i.l.bf16 %v851_v36  ;;  %296 = vrot.lane.b32.xlu1 %v1100_v33, %s1043_s15  ;;  %242 = vrot.lane.b32.xlu2 %v1102_v34, %s1043_s15 }
 0x139   :  { %v206_v41 = vpack.c.bf16 %v863_v37, %v863_v37  ;;  %v205_v42 = vpack.c.bf16 %v862_v38, %v862_v38  ;;  %v202_v43 = vpack.c.bf16 %v853_v39, %v853_v39  ;;  %v201_v44 = vpack.c.bf16 %v852_v40, %v852_v40 }
 0x13b   :  { %v321_v45 = vunpack.c.l.b16 %v206_v41  ;;  %v320_v46 = vunpack.c.l.b16 %v205_v42  ;;  %v267_v47 = vunpack.c.l.b16 %v202_v43  ;;  %v266_v48 = vunpack.c.l.b16 %v201_v44 }
 0x13d   :  { %v1108_v49 = vpack.c.b16 %v267_v47, %v266_v48  ;;  %v1110_v50 = vpack.c.b16 %v321_v45, %v320_v46 }
 0x13f   :  { %269 = vrot.lane.b32.xlu0 %v1108_v49, %s1043_s15  ;;  %323 = vrot.lane.b32.xlu2 %v1110_v50, %s1043_s15 }
 0x191   :  { %v243_v51 = vpop.permute.xlu2 %242 }
 0x192   :  { %v248_v52 = vsel %vm216_vm0, %v243_v51, 0 }
 0x193   :  { %257 = vmatpush.bf16.xpose.msra.mxu2 %v248_v52 }
 0x199   :  { %v324_v53 = vpop.permute.xlu2 %323 }
 0x19a   :  { %806 = vmatmul.msk.bf16.vlgmr.msra.gmra.mxu2 %vm216_vm0, %v1102_v34  ;;  %v329_v54 = vsel %vm216_vm0, %v324_v53, 0 }
 0x19b   :  { %338 = vmatpush.bf16.xpose.msrb.mxu2 %v329_v54 }
 0x1a0   :  { %v232_v56 = vpop.f32.mrf.mxu1 }
 0x1a1   :  { %v233_v57 = vadd.f32 %v232_v56, %v207_v55 }
 0x1a3   :  { %v346_v58 = vsel %vm345_vm1, %v233_v57, -inf }
 0x1a4   :  { %347 = vmax.xlane.f32.xlu0 %v346_v58 }
 0x1a8   :  { %v234_v60 = vpop.f32.mrf.mxu1 }
 0x1a9   :  { %v235_v61 = vadd.f32 %v234_v60, %v208_v59  ;;  %v297_v62 = vpop.permute.xlu1 %296 }
 0x1aa   :  { %809 = vmatmul.msk.bf16.vlgmr.msrb.gmra.mxu2 %vm216_vm0, %v1110_v50  ;;  %v302_v63 = vsel %vm216_vm0, %v297_v62, 0 }
 0x1ab   :  { %311 = vmatpush.bf16.xpose.msrb.mxu1 %v302_v63  ;;  %v349_v0 = vsel %vm345_vm1, %v235_v61, -inf }
 0x1ac   :  { %350 = vmax.xlane.f32.xlu1 %v349_v0 }
 0x1b1   :  { %v270_v1 = vpop.permute.xlu0 %269 }
 0x1b2   :  { %808 = vmatmul.msk.bf16.vlgmr.msrb.gmra.mxu1 %vm216_vm0, %v1100_v33  ;;  %v275_v2 = vsel %vm216_vm0, %v270_v1, 0 }
 0x1b3   :  { %284 = vmatpush.bf16.xpose.msra.mxu3 %v275_v2 }
 0x1ba   :  { %807 = vmatmul.msk.bf16.vlgmr.msra.gmra.mxu3 %vm216_vm0, %v1108_v49 }
 0x217   :  { %v348_v13 = vpop.xlane.xlu0 %347 }
 0x218   :  { %v376_v18 = vsub.f32 %v233_v57, %v348_v13 }
 0x21a   :  { %v386_v22 = vmul.f32 1.442695, %v376_v18 }
 0x21d   :  { %v259_v3 = vpop.f32.mrf.mxu2 }
 0x21e   :  { %v260_v4 = vadd.f32 %v259_v3, %v207_v55 }
 0x21f   :  { %v351_v5 = vpop.xlane.xlu1 %350 }
 0x220   :  { %v377_v6 = vsub.f32 %v235_v61, %v351_v5  ;;  %v352_v7 = vsel %vm345_vm1, %v260_v4, -inf }
 0x221   :  { %353 = vmax.xlane.f32.xlu0 %v352_v7 }
 0x222   :  { %v388_v8 = vmul.f32 1.442695, %v377_v6 }
 0x224   :  { %865 = vpow2.f32 %v388_v8 }
 0x225   :  { %v261_v9 = vpop.f32.mrf.mxu2  ;;  %867 = vpow2.f32 %v386_v22 }
 0x226   :  { %v1131_v10 = vadd.f32 %v261_v9, %v208_v59 }
 0x228   :  { %v355_v11 = vsel %vm345_vm1, %v1131_v10, -inf }
 0x229   :  { %356 = vmax.xlane.f32.xlu1 %v355_v11 }
 0x22a   :  { %v1135_v12 = vpop.eup %865 }
 0x22b   :  { %v409_v17 = vsel %vm345_vm1, %v1135_v12, 0.0  ;;  %v1145_v29 = vpop.eup %867 }
 0x22c   :  { %v406_v31 = vsel %vm345_vm1, %v1145_v29, 0.0 }
 0x22d   :  { %v340_v19 = vpop.f32.mrf.mxu2 }
 0x22e   :  { %v1140_v21 = vadd.f32 %v340_v19, %v207_v55 }
 0x22f   :  { %v313_v14 = vpop.f32.mrf.mxu1 }
 0x230   :  { %v314_v15 = vadd.f32 %v313_v14, %v207_v55  ;;  %v370_v25 = vsel %vm345_vm1, %v1140_v21, -inf }
 0x231   :  { %410 = vadd.xlane.f32.xlu1 %v409_v17 }
 0x232   :  { %v364_v20 = vsel %vm345_vm1, %v314_v15, -inf }
 0x233   :  { %365 = vmax.xlane.f32.xlu2 %v364_v20 }
 0x235   :  { %v342_v37 = vpop.f32.mrf.mxu2 }
 0x236   :  { %v343_v38 = vadd.f32 %v342_v37, %v208_v59 }
 0x237   :  { %v315_v23 = vpop.f32.mrf.mxu1 }
 0x238   :  { %v316_v24 = vadd.f32 %v315_v23, %v208_v59  ;;  %v373_v39 = vsel %vm345_vm1, %v343_v38, -inf }
 0x239   :  { %371 = vmax.xlane.f32.xlu1 %v370_v25 }
 0x23a   :  { %v367_v26 = vsel %vm345_vm1, %v316_v24, -inf }
 0x23b   :  { %368 = vmax.xlane.f32.xlu0 %v367_v26 }
 0x23d   :  { %v286_v27 = vpop.f32.mrf.mxu3 }
 0x23e   :  { %v287_v28 = vadd.f32 %v286_v27, %v207_v55 }
 0x240   :  { %v358_v30 = vsel %vm345_vm1, %v287_v28, -inf }
 0x241   :  { %359 = vmax.xlane.f32.xlu2 %v358_v30 }
 0x243   :  { %407 = vadd.xlane.f32.xlu0 %v406_v31 }
 0x245   :  { %v288_v32 = vpop.f32.mrf.mxu3 }
 0x246   :  { %v289_v35 = vadd.f32 %v288_v32, %v208_v59 }
 0x248   :  { %v361_v36 = vsel %vm345_vm1, %v289_v35, -inf }
 0x249   :  { %362 = vmax.xlane.f32.xlu2 %v361_v36 }
 0x251   :  { %374 = vmax.xlane.f32.xlu2 %v373_v39 }
 0x294   :  { %v354_v40 = vpop.xlane.xlu0 %353 }
 0x295   :  { %v378_v41 = vsub.f32 %v260_v4, %v354_v40 }
 0x297   :  { %v390_v42 = vmul.f32 1.442695, %v378_v41 }
 0x299   :  { %869 = vpow2.f32 %v390_v42 }
 0x29c   :  { %v357_v48 = vpop.xlane.xlu1 %356 }
 0x29d   :  { %v379_v63 = vsub.f32 %v1131_v10, %v357_v48 }
 0x29f   :  { %v1152_v43 = vpop.eup %869  ;;  %v392_v2 = vmul.f32 1.442695, %v379_v63 }
 0x2a0   :  { %v412_v44 = vsel %vm345_vm1, %v1152_v43, 0.0 }
 0x2a1   :  { %413 = vadd.xlane.f32.xlu1 %v412_v44 }
 0x2a4   :  { %v411_v58 = vpop.xlane.xlu1 %410 }
 0x2a6   :  { %v366_v45 = vpop.xlane.xlu2 %365 }
 0x2a7   :  { %v382_v46 = vsub.f32 %v314_v15, %v366_v45 }
 0x2a9   :  { %v398_v47 = vmul.f32 1.442695, %v382_v46 }
 0x2ab   :  { %871 = vpow2.f32 %v398_v47 }
 0x2ac   :  { %v372_v3 = vpop.xlane.xlu1 %371 }
 0x2ad   :  { %v384_v6 = vsub.f32 %v1140_v21, %v372_v3 }
 0x2ae   :  { %v369_v53 = vpop.xlane.xlu0 %368 }
 0x2af   :  { %v383_v56 = vsub.f32 %v316_v24, %v369_v53  ;;  %v402_v9 = vmul.f32 1.442695, %v384_v6 }
 0x2b1   :  { %v1156_v51 = vpop.eup %871  ;;  %v400_v59 = vmul.f32 1.442695, %v383_v56 }
 0x2b2   :  { %v424_v52 = vsel %vm345_vm1, %v1156_v51, 0.0 }
 0x2b3   :  { %425 = vadd.xlane.f32.xlu1 %v424_v52 }
 0x2b4   :  { %v360_v54 = vpop.xlane.xlu2 %359 }
 0x2b5   :  { %v380_v55 = vsub.f32 %v287_v28, %v360_v54 }
 0x2b6   :  { %v408_v20 = vpop.xlane.xlu0 %407 }
 0x2b7   :  { %v394_v57 = vmul.f32 1.442695, %v380_v55 }
 0x2b9   :  { %873 = vpow2.f32 %v394_v57 }
 0x2ba   :  { %875 = vpow2.f32 %v400_v59 }
 0x2bc   :  { %v363_v60 = vpop.xlane.xlu2 %362 }
 0x2bd   :  { %v381_v61 = vsub.f32 %v289_v35, %v363_v60 }
 0x2bf   :  { %v874_v62 = vpop.eup %873  ;;  %v396_v0 = vmul.f32 1.442695, %v381_v61 }
 0x2c0   :  { %v418_v1 = vsel %vm345_vm1, %v874_v62, 0.0  ;;  %v1162_v4 = vpop.eup %875 }
 0x2c1   :  { %877 = vpow2.f32 %v396_v0  ;;  %419 = vadd.xlane.f32.xlu2 %v418_v1  ;;  %v427_v7 = vsel %vm345_vm1, %v1162_v4, 0.0 }
 0x2c2   :  { %879 = vpow2.f32 %v392_v2 }
 0x2c3   :  { %881 = vpow2.f32 %v402_v9 }
 0x2c7   :  { %v878_v5 = vpop.eup %877 }
 0x2c8   :  { %v421_v8 = vsel %vm345_vm1, %v878_v5, 0.0  ;;  %v880_v10 = vpop.eup %879 }
 0x2c9   :  { %428 = vadd.xlane.f32.xlu2 %v427_v7  ;;  %422 = vadd.xlane.f32.xlu0 %v421_v8  ;;  %v415_v11 = vsel %vm345_vm1, %v880_v10, 0.0  ;;  %v1171_v13 = vpop.eup %881 }
 0x2ca   :  { %v430_v14 = vsel %vm345_vm1, %v1171_v13, 0.0 }
 0x2cc   :  { %521 = vrot.lane.b32.xlu1 %v1108_v49, %s1046_s18  ;;  %v375_v49 = vpop.xlane.xlu2 %374 }
 0x2cd   :  { %v385_v15 = vsub.f32 %v343_v38, %v375_v49 }
 0x2cf   :  { %v404_v17 = vmul.f32 1.442695, %v385_v15  ;;  %v603_v15 = vld [vmem:[#allocation7 + $0x8] sm:$0xf] }
 0x2d1   :  { %416 = vadd.xlane.f32.xlu2 %v415_v11  ;;  %883 = vpow2.f32 %v404_v17  ;;  %v666_v17 = vsel %vm614_vm2, %v603_v15, 0 }
 0x2d4   :  { %546 = vrot.lane.b32.xlu1 %v1100_v33, %s1046_s18 }
 0x2d7   :  { %v1178_v18 = vpop.eup %883 }
 0x2d8   :  { %v433_v33 = vsel %vm345_vm1, %v1178_v18, 0.0 }
 0x2d9   :  { %431 = vadd.xlane.f32.xlu2 %v430_v14 }
 0x2dc   :  { %571 = vrot.lane.b32.xlu1 %v1110_v50, %s1046_s18 }
 0x2dd   :  { %471 = vrot.lane.b32.xlu0 %v1093_v16, %s1046_s18 }
 0x2f1   :  { %496 = vrot.lane.b32.xlu2 %v1102_v34, %s1046_s18 }
 0x307   :  { %434 = vadd.xlane.f32.xlu0 %v433_v33  ;;  %v602_v33 = vld [vmem:[#allocation7 + $0x4] sm:$0xf] }
 0x314   :  { %v414_v19 = vpop.xlane.xlu1 %413 }
 0x326   :  { %v426_v22 = vpop.xlane.xlu1 %425 }
 0x334   :  { %v420_v21 = vpop.xlane.xlu2 %419 }
 0x335   :  { %885 = vrcp.f32 %v420_v21  ;;  %v604_v21 = vld [vmem:[#allocation7 + $0xc] sm:$0xf] }
 0x336   :  { %887 = vrcp.f32 %v408_v20  ;;  %v601_v20 = vld [vmem:[#allocation7] sm:$0xf] }
 0x33b   :  { %v886_v23 = vpop.eup %885 }
 0x33c   :  { %v423_v50 = vpop.xlane.xlu0 %422  ;;  %v429_v16 = vpop.xlane.xlu2 %428  ;;  %v450_v24 = vmul.f32 %v886_v23, %v874_v62 }
 0x33d   :  { %889 = vrcp.f32 %v423_v50  ;;  %v888_v25 = vpop.eup %887 }
 0x33e   :  { %891 = vrcp.f32 %v411_v58  ;;  %v522_v34 = vpop.permute.xlu1 %521  ;;  %v460_v28 = vpack.c.bf16 %v450_v24, %v450_v24  ;;  %v446_v32 = vmul.f32 %v888_v25, %v1145_v29 }
 0x33f   :  { %534 = vmatpush.bf16.msra.mxu2 %v522_v34  ;;  %893 = vrcp.f32 %v414_v19  ;;  %v641_v19 = vsel %vm614_vm2, %v602_v33, 0 }
 0x340   :  { %v518_v38 = vunpack.c.l.b16 %v460_v28  ;;  %v456_v41 = vpack.c.bf16 %v446_v32, %v446_v32 }
 0x342   :  { %v468_v29 = vunpack.c.l.b16 %v456_v41 }
 0x343   :  { %v890_v26 = vpop.eup %889  ;;  %650 = vmatpush.bf16.msrb.mxu2 %v641_v19 }
 0x344   :  { %v892_v27 = vpop.eup %891  ;;  %v451_v30 = vmul.f32 %v890_v26, %v878_v5  ;;  %v417_v31 = vpop.xlane.xlu2 %416 }
 0x345   :  { %895 = vrcp.f32 %v417_v31  ;;  %v447_v37 = vmul.f32 %v892_v27, %v1135_v12  ;;  %v894_v40 = vpop.eup %893 }
 0x346   :  { %v461_v35 = vpack.c.bf16 %v451_v30, %v451_v30  ;;  %v547_v36 = vpop.permute.xlu1 %546  ;;  %v448_v46 = vmul.f32 %v894_v40, %v1152_v43  ;;  %897 = vrcp.f32 %v429_v16 }
 0x347   :  { %v457_v45 = vpack.c.bf16 %v447_v37, %v447_v37  ;;  %899 = vrcp.f32 %v426_v22  ;;  %v691_v22 = vsel %vm614_vm2, %v604_v21, 0 }
 0x348   :  { %v519_v39 = vunpack.c.l.b16 %v461_v35  ;;  %v458_v55 = vpack.c.bf16 %v448_v46, %v448_v46 }
 0x349   :  { %v469_v54 = vunpack.c.l.b16 %v457_v45  ;;  %v605_v45 = vld [vmem:[#allocation7 + $0x10] sm:$0xf] }
 0x34a   :  { %v520_v42 = vpack.c.b16 %v519_v39, %v518_v38  ;;  %v493_v59 = vunpack.c.l.b16 %v458_v55  ;;  %v716_v46 = vsel %vm614_vm2, %v605_v45, 0 }
 0x34b   :  { %v896_v44 = vpop.eup %895  ;;  %v470_v56 = vpack.c.b16 %v469_v54, %v468_v29 }
 0x34c   :  { %v449_v47 = vmul.f32 %v896_v44, %v880_v10  ;;  %812 = vmatmul.msk.bf16.vlgmr.msra.gmra.mxu2 %vm345_vm1, %v520_v42  ;;  %v432_v48 = vpop.xlane.xlu2 %431  ;;  %v898_v57 = vpop.eup %897 }
 0x34d   :  { %v900_v43 = vpop.eup %899  ;;  %v453_v61 = vmul.f32 %v898_v57, %v1162_v4  ;;  %901 = vrcp.f32 %v432_v48 }
 0x34e   :  { %v459_v52 = vpack.c.bf16 %v449_v47, %v449_v47  ;;  %v572_v53 = vpop.permute.xlu1 %571  ;;  %v452_v63 = vmul.f32 %v900_v43, %v1156_v51 }
 0x34f   :  { %584 = vmatpush.bf16.msrb.mxu0 %v572_v53  ;;  %v472_v12 = vpop.permute.xlu0 %471  ;;  %v463_v0 = vpack.c.bf16 %v453_v61, %v453_v61 }
 0x350   :  { %484 = vmatpush.bf16.msrb.mxu3 %v472_v12  ;;  %v494_v58 = vunpack.c.l.b16 %v459_v52  ;;  %v462_v1 = vpack.c.bf16 %v452_v63, %v452_v63 }
 0x351   :  { %v544_v2 = vunpack.c.l.b16 %v463_v0 }
 0x352   :  { %v495_v62 = vpack.c.b16 %v494_v58, %v493_v59  ;;  %v543_v3 = vunpack.c.l.b16 %v462_v1 }
 0x353   :  { %810 = vmatmul.msk.bf16.vlgmr.msrb.gmra.mxu3 %vm345_vm1, %v470_v56  ;;  %v902_v7 = vpop.eup %901  ;;  %700 = vmatpush.bf16.msra.mxu0 %v691_v22 }
 0x354   :  { %559 = vmatpush.bf16.msra.mxu3 %v547_v36  ;;  %v497_v60 = vpop.permute.xlu2 %496  ;;  %v545_v5 = vpack.c.b16 %v544_v2, %v543_v3  ;;  %v454_v8 = vmul.f32 %v902_v7, %v1171_v13  ;;  %v616_v13 = vsel %vm614_vm2, %v601_v20, 0 }
 0x355   :  { %509 = vmatpush.bf16.msra.mxu1 %v497_v60 }
 0x356   :  { %v464_v9 = vpack.c.bf16 %v454_v8, %v454_v8 }
 0x358   :  { %811 = vmatmul.msk.bf16.vlgmr.msra.gmra.mxu1 %vm345_vm1, %v495_v62  ;;  %v568_v11 = vunpack.c.l.b16 %v464_v9  ;;  %675 = vmatpush.bf16.msrb.mxu3 %v666_v17 }
 0x359   :  { %625 = vmatpush.bf16.msrb.mxu1 %v616_v13 }
 0x35d   :  { %725 = vmatpush.bf16.msra.mxu1 %v716_v46 }
 0x363   :  { %813 = vmatmul.msk.bf16.vlgmr.msra.gmra.mxu3 %vm345_vm1, %v545_v5 }
 0x37a   :  { %v435_v6 = vpop.xlane.xlu0 %434 }
 0x37b   :  { %903 = vrcp.f32 %v435_v6  ;;  %v864_v6 = vld [vmem:[%s1216_s3] ss:$0 sm:$0xff] }
 0x381   :  { %v904_v4 = vpop.eup %903 }
 0x382   :  { %v455_v10 = vmul.f32 %v904_v4, %v1178_v18 }
 0x384   :  { %v465_v51 = vpack.c.bf16 %v455_v10, %v455_v10 }
 0x386   :  { %v569_v14 = vunpack.c.l.b16 %v465_v51 }
 0x388   :  { %v570_v49 = vpack.c.b16 %v569_v14, %v568_v11 }
 0x38a   :  { %814 = vmatmul.msk.bf16.vlgmr.msrb.gmra.mxu0 %vm345_vm1, %v570_v49 }
 0x3cf   :  { %v536_v18 = vpop.f32.mrf.mxu2 }
 0x3d0   :  { %v595_v16 = vpack.c.bf16 %v536_v18, %v536_v18 }
 0x3d2   :  { %v659_v25 = vunpack.c.l.b16 %v595_v16 }
 0x3d5   :  { %v511_v50 = vpop.f32.mrf.mxu1 }
 0x3d6   :  { %v486_v23 = vpop.f32.mrf.mxu3  ;;  %v593_v27 = vpack.c.bf16 %v511_v50, %v511_v50 }
 0x3d7   :  { %v538_v34 = vpop.f32.mrf.mxu2  ;;  %v591_v30 = vpack.c.bf16 %v486_v23, %v486_v23 }
 0x3d8   :  { %v596_v24 = vpack.c.bf16 %v538_v34, %v538_v34  ;;  %v634_v37 = vunpack.c.l.b16 %v593_v27 }
 0x3d9   :  { %v608_v39 = vunpack.c.l.b16 %v591_v30 }
 0x3da   :  { %v660_v26 = vunpack.c.l.b16 %v596_v24 }
 0x3dc   :  { %v661_v28 = vpack.c.b16 %v660_v26, %v659_v25 }
 0x3dd   :  { %v513_v31 = vpop.f32.mrf.mxu1 }
 0x3de   :  { %v594_v32 = vpack.c.bf16 %v513_v31, %v513_v31  ;;  %v488_v35 = vpop.f32.mrf.mxu3  ;;  %817 = vmatmul.msk.bf16.vlgmr.msrb.gmra.mxu3 %vm216_vm0, %v661_v28 }
 0x3df   :  { %v592_v36 = vpack.c.bf16 %v488_v35, %v488_v35 }
 0x3e0   :  { %v635_v38 = vunpack.c.l.b16 %v594_v32 }
 0x3e1   :  { %v609_v40 = vunpack.c.l.b16 %v592_v36 }
 0x3e2   :  { %v636_v41 = vpack.c.b16 %v635_v38, %v634_v37 }
 0x3e3   :  { %v610_v42 = vpack.c.b16 %v609_v40, %v608_v39 }
 0x3e4   :  { %816 = vmatmul.msk.bf16.vlgmr.msrb.gmra.mxu2 %vm216_vm0, %v636_v41 }
 0x3e5   :  { %815 = vmatmul.msk.bf16.vlgmr.msrb.gmra.mxu1 %vm216_vm0, %v610_v42 }
 0x3e6   :  { %v561_v44 = vpop.f32.mrf.mxu3 }
 0x3e7   :  { %v597_v47 = vpack.c.bf16 %v561_v44, %v561_v44 }
 0x3e9   :  { %v684_v52 = vunpack.c.l.b16 %v597_v47 }
 0x3ee   :  { %v563_v48 = vpop.f32.mrf.mxu3 }
 0x3ef   :  { %v598_v29 = vpack.c.bf16 %v563_v48, %v563_v48 }
 0x3f1   :  { %v685_v53 = vunpack.c.l.b16 %v598_v29 }
 0x3f3   :  { %v686_v54 = vpack.c.b16 %v685_v53, %v684_v52 }
 0x3f5   :  { %818 = vmatmul.msk.bf16.vlgmr.msra.gmra.mxu0 %vm216_vm0, %v686_v54 }
 0x407   :  { %v586_v12 = vpop.f32.mrf.mxu0 }
 0x408   :  { %v599_v55 = vpack.c.bf16 %v586_v12, %v586_v12 }
 0x40a   :  { %v709_v58 = vunpack.c.l.b16 %v599_v55 }
 0x40f   :  { %v588_v56 = vpop.f32.mrf.mxu0 }
 0x410   :  { %v600_v57 = vpack.c.bf16 %v588_v56, %v588_v56 }
 0x412   :  { %v710_v43 = vunpack.c.l.b16 %v600_v57 }
 0x414   :  { %v711_v59 = vpack.c.b16 %v710_v43, %v709_v58 }
 0x416   :  { %819 = vmatmul.msk.bf16.vlgmr.msra.gmra.mxu1 %vm216_vm0, %v711_v59 }
 0x461   :  { %v677_v0 = vpop.f32.mrf.mxu3 }
 0x462   :  { %v627_v60 = vpop.f32.mrf.mxu1 }
 0x467   :  { %v652_v61 = vpop.f32.mrf.mxu2 }
 0x468   :  { %v732_v63 = vadd.f32 %v652_v61, %v627_v60 }
 0x469   :  { %v679_v10 = vpop.f32.mrf.mxu3 }
 0x46a   :  { %v629_v62 = vpop.f32.mrf.mxu1  ;;  %v733_v2 = vadd.f32 %v732_v63, %v677_v0 }
 0x46f   :  { %v654_v3 = vpop.f32.mrf.mxu2 }
 0x470   :  { %v736_v8 = vadd.f32 %v654_v3, %v629_v62 }
 0x472   :  { %v702_v1 = vpop.f32.mrf.mxu0  ;;  %v737_v11 = vadd.f32 %v736_v8, %v679_v10 }
 0x473   :  { %v734_v5 = vadd.f32 %v733_v2, %v702_v1 }
 0x47a   :  { %v704_v51 = vpop.f32.mrf.mxu0 }
 0x47b   :  { %v738_v14 = vadd.f32 %v737_v11, %v704_v51 }
 0x493   :  { %v727_v7 = vpop.f32.mrf.mxu1 }
 0x494   :  { %v735_v4 = vadd.f32 %v734_v5, %v727_v7 }
 0x496   :  { %v744_v9 = vadd.f32 %v864_v6, %v735_v4 }
 0x498   :  { %746 = vst [vmem:[#allocation10] sm:$0xff] %v744_v9 }
 0x49b   :  { %v729_v49 = vpop.f32.mrf.mxu1 }
 0x49c   :  { %v739_v15 = vadd.f32 %v738_v14, %v729_v49 }
 0x49e   :  { %v745_v17 = vadd.f32 %v864_v6, %v739_v15 }
 0x4a0   :  { %747 = vst [vmem:[#allocation10 + $0x8] sm:$0xff] %v745_v17 }
 0x4a1   :  { %760 = dma.vmem_to_hbm [thread:$0]  %s753_s22, 256, %s755_s25, [#allocation4], %s1039_s13, %s1039_s13, %s1040_s14  }
 0x4a2   :  { %1031 = dma.done.wait [#allocation4], 256  }
 0x4a3   :  { %1032 = vsyncadd [#allocation4], 4294967040 }
 0x4a4   :  { %765 = vsyncpa [#allocation3], 1 }
 0x4a5   :  { %766 = vsyncpa [#allocation6], 1 }
 0x4a6   :  { %767 = vsyncpa [#allocation9], 1 }
 0x4a7   :  { %768 = vsyncpa [#allocation4], 1 }

</bundles_post_ra>
